<compile_context>
chip_gen: v5e
topology: v5e:2x2
jax: 0.10.0
libtpu: 0.0.40
codegen_flags: <defaults>
</compile_context>

<pallas_src>
import jax
import jax.numpy as jnp
from jax.experimental import pallas as pl
from jax.experimental.pallas import tpu as pltpu

BN_EPS = 1e-9  # matches Dice's nn.BatchNorm1d(num_features, eps=1e-9)


def _h1_tile(q, ub, wq_ref, wub_ref, wqu_ref, b1_ref):
    """First fc1 Linear for one batch tile via the split-W1 fold (no 4E concat)."""
    TB, T, E = ub.shape
    H1 = wq_ref.shape[1]
    ub2 = ub.reshape(TB * T, E)
    qu2 = (q[:, None, :] * ub).reshape(TB * T, E)
    # Query term: B rows instead of B*T rows, broadcast over T.
    hq = jnp.dot(q, wq_ref[...], preferred_element_type=jnp.float32)            # (TB, H1)
    h = (jnp.dot(ub2, wub_ref[...], preferred_element_type=jnp.float32)
         + jnp.dot(qu2, wqu_ref[...], preferred_element_type=jnp.float32))      # (TB*T, H1)
    return h.reshape(TB, T, H1) + hq[:, None, :] + b1_ref[...]                  # (TB, T, H1) f32


def _din_stats_kernel(q_ref, ub_ref, wq_ref, wub_ref, wqu_ref, b1_ref,
                      sum_ref, sumsq_ref):
    """Pass 1: accumulate global sum / sum-of-squares of h1 over all B*T rows."""
    h1 = _h1_tile(q_ref[...], ub_ref[...], wq_ref, wub_ref, wqu_ref, b1_ref)
    TB, T, H1 = h1.shape
    h2d = h1.reshape(TB * T, H1)
    s = jnp.sum(h2d, axis=0, keepdims=True)                                     # (1, H1)
    ss = jnp.sum(h2d * h2d, axis=0, keepdims=True)                              # (1, H1)

    @pl.when(pl.program_id(0) == 0)
    def _():
        sum_ref[...] = jnp.zeros_like(sum_ref)
        sumsq_ref[...] = jnp.zeros_like(sumsq_ref)

    sum_ref[...] += s
    sumsq_ref[...] += ss


def _din_apply_kernel(q_ref, ub_ref, mask_ref,
                      wq_ref, wub_ref, wqu_ref, b1_ref,
                      mean_ref, rstd_ref, gamma_ref, beta_ref, alpha_ref,
                      w23_ref, b23_ref,
                      out_ref):
    """Pass 2: Dice + folded Linear/fc2 score + mask + weighted pooling per batch tile."""
    ub = ub_ref[...]                                                            # (TB, T, E)
    h1 = _h1_tile(q_ref[...], ub, wq_ref, wub_ref, wqu_ref, b1_ref)             # (TB, T, H1) f32

    # Dice: p = sigmoid(gamma * bn(h1) + beta);  a1 = h1 * (alpha + p*(1-alpha)).
    xn = (h1 - mean_ref[...]) * rstd_ref[...]
    p = jax.nn.sigmoid(xn * gamma_ref[...] + beta_ref[...])
    a1 = h1 * (alpha_ref[...] + p * (1.0 - alpha_ref[...]))

    # Folded (Linear(H1,H2) . Linear(H2,1)) -> one lane reduction against w23 (1,H1).
    score = jnp.sum(a1 * w23_ref[...], axis=-1) + b23_ref[...]                  # (TB, T)
    score = score * (1.0 - mask_ref[...])                                       # masked -> 0

    # Weighted pooling over T.  For production-sized T route this through the MXU
    # (jnp.einsum('bt,bte->be', ...)); for small T the VPU+sublane reduce is fine.
    out_ref[...] = jnp.sum(score[:, :, None] * ub, axis=1).astype(out_ref.dtype)


def init_params(key, embedding_dim, hidden_unit):
    """Deterministic synthetic parameters (PyTorch Linear-style uniform init)."""
    h1, h2 = hidden_unit
    in1 = 4 * embedding_dim
    ks = jax.random.split(key, 6)

    def lin(kw, kb, fan_in, fan_out):
        bound = 1.0 / jnp.sqrt(float(fan_in))
        w = jax.random.uniform(kw, (fan_in, fan_out), jnp.float32, -bound, bound)
        b = jax.random.uniform(kb, (1, fan_out), jnp.float32, -bound, bound)
        return w, b

    w1, b1 = lin(ks[0], ks[1], in1, h1)
    w2, b2 = lin(ks[2], ks[3], h1, h2)
    w3, b3 = lin(ks[4], ks[5], h2, 1)
    return {
        "w1": w1, "b1": b1,
        # Dice / BatchNorm1d(h1) params: gamma=1, beta=0, alpha=torch.zeros
        "gamma": jnp.ones((1, h1), jnp.float32),
        "beta": jnp.zeros((1, h1), jnp.float32),
        "alpha": jnp.zeros((1, h1), jnp.float32),
        "w2": w2, "b2": b2,
        "w3": w3, "b3": b3,   # natural (H2,1)/(1,1); folding is done in the wrapper
    }


def attention_sequence_pooling(query_ad, user_behavior, mask, params, *,
                               batch_tile=None, mxu_dtype=jnp.float32):
    B, T, E = user_behavior.shape
    H1 = params["w1"].shape[1]
    if batch_tile is None or B % batch_tile != 0:
        batch_tile = B
    n_tiles = B // batch_tile
    n_rows = B * T

    # ---------- exact wrapper-side algebraic folds ----------
    w1a, w1b, w1c, w1d = jnp.split(params["w1"].astype(jnp.float32), 4, axis=0)
    wq = (w1a + w1c).astype(mxu_dtype)     # query term
    wub = (w1b - w1c).astype(mxu_dtype)    # behavior term
    wqu = w1d.astype(mxu_dtype)            # query*behavior term
    b1 = params["b1"].astype(jnp.float32)
    w23 = (params["w2"] @ params["w3"]).reshape(1, H1).astype(jnp.float32)       # (1, H1)
    b23 = (params["b2"] @ params["w3"] + params["b3"]).astype(jnp.float32)       # (1, 1)
    gamma = params["gamma"].astype(jnp.float32)
    beta = params["beta"].astype(jnp.float32)
    alpha = params["alpha"].astype(jnp.float32)

    q2d = query_ad.reshape(B, E).astype(mxu_dtype)
    ub = user_behavior.astype(mxu_dtype)
    maskf = mask.astype(jnp.float32)       # 1.0 where masked

    def full(a):  # whole (2-D) array resident each grid step
        return pl.BlockSpec(a.shape, lambda i: (0, 0))

    q_spec = pl.BlockSpec((batch_tile, E), lambda i: (i, 0))
    ub_spec = pl.BlockSpec((batch_tile, T, E), lambda i: (i, 0, 0))
    mask_spec = pl.BlockSpec((batch_tile, T), lambda i: (i, 0))
    # NOTE: for production configs keep E a multiple of 128 so the output store is
    # lane-dense (avoids masked vst.msk partial stores).
    out_spec = pl.BlockSpec((batch_tile, E), lambda i: (i, 0))
    stat_spec = pl.BlockSpec((1, H1), lambda i: (0, 0))

    vmem_limit = 32 * 1024 * 1024  # safe on v5e/v6e/v7x; raise per-chip for big tiles

    # ---------- pass 1: global Dice/BatchNorm statistics over B*T ----------
    sums, sumsqs = pl.pallas_call(
        _din_stats_kernel,
        grid=(n_tiles,),
        in_specs=[q_spec, ub_spec, full(wq), full(wub), full(wqu), full(b1)],
        out_specs=(stat_spec, stat_spec),
        out_shape=(jax.ShapeDtypeStruct((1, H1), jnp.float32),
                   jax.ShapeDtypeStruct((1, H1), jnp.float32)),
        compiler_params=pltpu.CompilerParams(
            dimension_semantics=("arbitrary",),      # accumulating output across grid
            vmem_limit_bytes=vmem_limit),
        cost_estimate=pl.CostEstimate(
            flops=int(4 * n_rows * E * H1 + 2 * B * E * H1 + 6 * n_rows * H1),
            transcendentals=0,
            bytes_accessed=int(4 * (B * E + B * T * E + 3 * E * H1 + 3 * H1))),
    )(q2d, ub, wq, wub, wqu, b1)

    mean = sums / n_rows
    var = sumsqs / n_rows - mean * mean
    rstd = jax.lax.rsqrt(var + BN_EPS)

    # ---------- pass 2: batch-tiled apply (independent tiles -> "parallel") ----------
    out = pl.pallas_call(
        _din_apply_kernel,
        grid=(n_tiles,),
        in_specs=[q_spec, ub_spec, mask_spec,
                  full(wq), full(wub), full(wqu), full(b1),
                  full(mean), full(rstd), full(gamma), full(beta), full(alpha),
                  full(w23), full(b23)],
        out_specs=out_spec,
        out_shape=jax.ShapeDtypeStruct((B, E), jnp.float32),
        compiler_params=pltpu.CompilerParams(
            dimension_semantics=("parallel",),       # v7x: split batch tiles across TCs
            vmem_limit_bytes=vmem_limit),
        cost_estimate=pl.CostEstimate(
            flops=int(4 * n_rows * E * H1 + 2 * B * E * H1
                      + 12 * n_rows * H1 + 4 * n_rows * E),
            transcendentals=int(n_rows * H1),
            bytes_accessed=int(4 * (2 * B * E + B * T * E + B * T
                                    + 3 * E * H1 + 8 * H1 + 1))),
    )(q2d, ub, maskf, wq, wub, wqu, b1, mean, rstd, gamma, beta, alpha, w23, b23)

    return out.reshape(B, 1, E)


def reference_jax(query_ad, user_behavior, mask, params):
    """Pure-JAX reference mirroring the PyTorch forward (unfolded weights)."""
    B, T, E = user_behavior.shape
    q = jnp.broadcast_to(query_ad, (B, T, E))
    ub = user_behavior
    att_in = jnp.concatenate([q, ub, q - ub, q * ub], axis=-1).reshape(B * T, 4 * E)
    h1 = att_in @ params["w1"] + params["b1"]
    mean = jnp.mean(h1, axis=0, keepdims=True)
    var = jnp.mean((h1 - mean) ** 2, axis=0, keepdims=True)
    p = jax.nn.sigmoid((h1 - mean) / jnp.sqrt(var + BN_EPS) * params["gamma"] + params["beta"])
    a1 = params["alpha"] * (1 - p) * h1 + p * h1
    h2 = a1 @ params["w2"] + params["b2"]
    score = (h2 @ params["w3"] + params["b3"]).reshape(B, T)
    score = jnp.where(mask, 0.0, score)
    return jnp.einsum("bt,bte->be", score, ub)[:, None, :]


if __name__ == "__main__":
    B, T, E = 16, 8, 32
    hidden_unit = (64, 32)

    key = jax.random.PRNGKey(0)
    k_q, k_ub, k_m, k_p = jax.random.split(key, 4)
    query_ad = jax.random.normal(k_q, (B, 1, E), jnp.float32)
    user_behavior = jax.random.normal(k_ub, (B, T, E), jnp.float32)
    mask = jax.random.bernoulli(k_m, 0.25, (B, T))   # True = masked position
    params = init_params(k_p, E, hidden_unit)

    # batch_tile=8 -> 2 batch tiles, exercises the tiled grid + global-stats pass.
    out = attention_sequence_pooling(query_ad, user_behavior, mask, params,
                                     batch_tile=8, mxu_dtype=jnp.float32)
    out = jax.block_until_ready(out)

    ref = reference_jax(query_ad, user_behavior, mask, params)
    assert out.shape == (B, 1, E)
    assert jnp.allclose(out, ref, atol=1e-4, rtol=1e-4), "mismatch vs pure-JAX reference"

    print("KERNEL_OK")
</pallas_src>

<mosaic_0001>
module attributes {stable_mosaic.version = 11 : i64} {
  func.func @_din_stats_kernel(%arg0: i32, %arg1: memref<8x32xf32, #tpu.memory_space<vmem>>, %arg2: memref<8x8x32xf32, #tpu.memory_space<vmem>>, %arg3: memref<32x64xf32, #tpu.memory_space<vmem>>, %arg4: memref<32x64xf32, #tpu.memory_space<vmem>>, %arg5: memref<32x64xf32, #tpu.memory_space<vmem>>, %arg6: memref<1x64xf32, #tpu.memory_space<vmem>>, %arg7: memref<1x64xf32, #tpu.memory_space<vmem>>, %arg8: memref<1x64xf32, #tpu.memory_space<vmem>>) attributes {dimension_semantics = [#tpu.dimension_semantics<arbitrary>], iteration_bounds = array<i64: 2>, scalar_prefetch = 0 : i64, scratch_operands = 0 : i64, tpu.core_type = #tpu.core_type<tc>, window_params = [{transform_indices = @transform_0, window_bounds = array<i64: 8, 32>}, {transform_indices = @transform_1, window_bounds = array<i64: 8, 8, 32>}, {pipeline_mode = #tpu.pipeline_mode<synchronous>, transform_indices = @transform_2, window_bounds = array<i64: 32, 64>}, {pipeline_mode = #tpu.pipeline_mode<synchronous>, transform_indices = @transform_3, window_bounds = array<i64: 32, 64>}, {pipeline_mode = #tpu.pipeline_mode<synchronous>, transform_indices = @transform_4, window_bounds = array<i64: 32, 64>}, {pipeline_mode = #tpu.pipeline_mode<synchronous>, transform_indices = @transform_5, window_bounds = array<i64: 1, 64>}, {pipeline_mode = #tpu.pipeline_mode<synchronous>, transform_indices = @transform_6, window_bounds = array<i64: 1, 64>}, {pipeline_mode = #tpu.pipeline_mode<synchronous>, transform_indices = @transform_7, window_bounds = array<i64: 1, 64>}]} {
    %c0 = arith.constant 0 : index
    %c0_0 = arith.constant 0 : index
    %0 = vector.load %arg1[%c0, %c0_0] : memref<8x32xf32, #tpu.memory_space<vmem>>, vector<8x32xf32>
    %c0_1 = arith.constant 0 : index
    %c0_2 = arith.constant 0 : index
    %c0_3 = arith.constant 0 : index
    %1 = vector.load %arg2[%c0_1, %c0_2, %c0_3] : memref<8x8x32xf32, #tpu.memory_space<vmem>>, vector<8x8x32xf32>
    %2 = vector.shape_cast %1 : vector<8x8x32xf32> to vector<64x32xf32>
    %3 = vector.shape_cast %0 : vector<8x32xf32> to vector<8x1x32xf32>
    %4 = vector.broadcast %3 : vector<8x1x32xf32> to vector<8x8x32xf32>
    %5 = arith.mulf %4, %1 : vector<8x8x32xf32>
    %6 = vector.shape_cast %5 : vector<8x8x32xf32> to vector<64x32xf32>
    %c0_4 = arith.constant 0 : index
    %c0_5 = arith.constant 0 : index
    %7 = vector.load %arg3[%c0_4, %c0_5] : memref<32x64xf32, #tpu.memory_space<vmem>>, vector<32x64xf32>
    %cst = arith.constant dense<0.000000e+00> : vector<8x64xf32>
    %8 = tpu.matmul %0, %7, %cst {dimension_numbers = #tpu.dot_dimension_numbers<[1], [0], [0], [1], [0, 0, 1, 1], [], []>} : vector<8x32xf32>, vector<32x64xf32>, vector<8x64xf32> -> vector<8x64xf32>
    %c0_6 = arith.constant 0 : index
    %c0_7 = arith.constant 0 : index
    %9 = vector.load %arg4[%c0_6, %c0_7] : memref<32x64xf32, #tpu.memory_space<vmem>>, vector<32x64xf32>
    %cst_8 = arith.constant dense<0.000000e+00> : vector<64x64xf32>
    %10 = tpu.matmul %2, %9, %cst_8 {dimension_numbers = #tpu.dot_dimension_numbers<[1], [0], [0], [1], [0, 0, 1, 1], [], []>} : vector<64x32xf32>, vector<32x64xf32>, vector<64x64xf32> -> vector<64x64xf32>
    %c0_9 = arith.constant 0 : index
    %c0_10 = arith.constant 0 : index
    %11 = vector.load %arg5[%c0_9, %c0_10] : memref<32x64xf32, #tpu.memory_space<vmem>>, vector<32x64xf32>
    %cst_11 = arith.constant dense<0.000000e+00> : vector<64x64xf32>
    %12 = tpu.matmul %6, %11, %cst_11 {dimension_numbers = #tpu.dot_dimension_numbers<[1], [0], [0], [1], [0, 0, 1, 1], [], []>} : vector<64x32xf32>, vector<32x64xf32>, vector<64x64xf32> -> vector<64x64xf32>
    %13 = arith.addf %10, %12 : vector<64x64xf32>
    %14 = vector.shape_cast %13 : vector<64x64xf32> to vector<8x8x64xf32>
    %15 = vector.shape_cast %8 : vector<8x64xf32> to vector<8x1x64xf32>
    %16 = vector.broadcast %15 : vector<8x1x64xf32> to vector<8x8x64xf32>
    %17 = arith.addf %14, %16 : vector<8x8x64xf32>
    %c0_12 = arith.constant 0 : index
    %c0_13 = arith.constant 0 : index
    %18 = vector.load %arg6[%c0_12, %c0_13] : memref<1x64xf32, #tpu.memory_space<vmem>>, vector<1x64xf32>
    %19 = vector.shape_cast %18 : vector<1x64xf32> to vector<1x1x64xf32>
    %20 = vector.broadcast %19 : vector<1x1x64xf32> to vector<8x8x64xf32>
    %21 = arith.addf %17, %20 : vector<8x8x64xf32>
    %22 = vector.shape_cast %21 : vector<8x8x64xf32> to vector<64x64xf32>
    %cst_14 = arith.constant dense<0.000000e+00> : vector<64xf32>
    %23 = vector.multi_reduction <add>, %22, %cst_14 [0] : vector<64x64xf32> to vector<64xf32>
    %24 = vector.shape_cast %23 : vector<64xf32> to vector<1x64xf32>
    %25 = arith.mulf %22, %22 : vector<64x64xf32>
    %cst_15 = arith.constant dense<0.000000e+00> : vector<64xf32>
    %26 = vector.multi_reduction <add>, %25, %cst_15 [0] : vector<64x64xf32> to vector<64xf32>
    %27 = vector.shape_cast %26 : vector<64xf32> to vector<1x64xf32>
    %c0_i32 = arith.constant 0 : i32
    %28 = arith.cmpi eq, %arg0, %c0_i32 : i32
    %29 = arith.extui %28 : i1 to i32
    %c0_i32_16 = arith.constant 0 : i32
    %30 = arith.cmpi ne, %29, %c0_i32_16 : i32
    scf.if %30 {
      %cst_25 = arith.constant 0.000000e+00 : f32
      %37 = vector.broadcast %cst_25 : f32 to vector<1x64xf32>
      %c0_26 = arith.constant 0 : index
      %c0_27 = arith.constant 0 : index
      %38 = vector.load %arg7[%c0_26, %c0_27] : memref<1x64xf32, #tpu.memory_space<vmem>>, vector<1x64xf32>
      tpu.vector_store %arg7[%c0_26, %c0_27], %37 {strides = array<i32>} : memref<1x64xf32, #tpu.memory_space<vmem>>, vector<1x64xf32>,
      %cst_28 = arith.constant 0.000000e+00 : f32
      %39 = vector.broadcast %cst_28 : f32 to vector<1x64xf32>
      %c0_29 = arith.constant 0 : index
      %c0_30 = arith.constant 0 : index
      %40 = vector.load %arg8[%c0_29, %c0_30] : memref<1x64xf32, #tpu.memory_space<vmem>>, vector<1x64xf32>
      tpu.vector_store %arg8[%c0_29, %c0_30], %39 {strides = array<i32>} : memref<1x64xf32, #tpu.memory_space<vmem>>, vector<1x64xf32>,
    } else {
    }
    %c0_17 = arith.constant 0 : index
    %c0_18 = arith.constant 0 : index
    %31 = vector.load %arg7[%c0_17, %c0_18] : memref<1x64xf32, #tpu.memory_space<vmem>>, vector<1x64xf32>
    %32 = arith.addf %31, %24 : vector<1x64xf32>
    %c0_19 = arith.constant 0 : index
    %c0_20 = arith.constant 0 : index
    %33 = vector.load %arg7[%c0_19, %c0_20] : memref<1x64xf32, #tpu.memory_space<vmem>>, vector<1x64xf32>
    tpu.vector_store %arg7[%c0_19, %c0_20], %32 {strides = array<i32>} : memref<1x64xf32, #tpu.memory_space<vmem>>, vector<1x64xf32>,
    %c0_21 = arith.constant 0 : index
    %c0_22 = arith.constant 0 : index
    %34 = vector.load %arg8[%c0_21, %c0_22] : memref<1x64xf32, #tpu.memory_space<vmem>>, vector<1x64xf32>
    %35 = arith.addf %34, %27 : vector<1x64xf32>
    %c0_23 = arith.constant 0 : index
    %c0_24 = arith.constant 0 : index
    %36 = vector.load %arg8[%c0_23, %c0_24] : memref<1x64xf32, #tpu.memory_space<vmem>>, vector<1x64xf32>
    tpu.vector_store %arg8[%c0_23, %c0_24], %35 {strides = array<i32>} : memref<1x64xf32, #tpu.memory_space<vmem>>, vector<1x64xf32>,
    return
  }
  func.func @transform_0(%arg0: i32) -> (i32, i32) {
    %c0_i32 = arith.constant 0 : i32
    %c0_i32_0 = arith.constant 0 : i32
    return %arg0, %c0_i32 : i32, i32
  }
  func.func @transform_1(%arg0: i32) -> (i32, i32, i32) {
    %c0_i32 = arith.constant 0 : i32
    %c0_i32_0 = arith.constant 0 : i32
    %c0_i32_1 = arith.constant 0 : i32
    return %arg0, %c0_i32, %c0_i32_0 : i32, i32, i32
  }
  func.func @transform_2(%arg0: i32) -> (i32, i32) {
    %c0_i32 = arith.constant 0 : i32
    %c0_i32_0 = arith.constant 0 : i32
    %c0_i32_1 = arith.constant 0 : i32
    return %c0_i32, %c0_i32_0 : i32, i32
  }
  func.func @transform_3(%arg0: i32) -> (i32, i32) {
    %c0_i32 = arith.constant 0 : i32
    %c0_i32_0 = arith.constant 0 : i32
    %c0_i32_1 = arith.constant 0 : i32
    return %c0_i32, %c0_i32_0 : i32, i32
  }
  func.func @transform_4(%arg0: i32) -> (i32, i32) {
    %c0_i32 = arith.constant 0 : i32
    %c0_i32_0 = arith.constant 0 : i32
    %c0_i32_1 = arith.constant 0 : i32
    return %c0_i32, %c0_i32_0 : i32, i32
  }
  func.func @transform_5(%arg0: i32) -> (i32, i32) {
    %c0_i32 = arith.constant 0 : i32
    %c0_i32_0 = arith.constant 0 : i32
    %c0_i32_1 = arith.constant 0 : i32
    return %c0_i32, %c0_i32_0 : i32, i32
  }
  func.func @transform_6(%arg0: i32) -> (i32, i32) {
    %c0_i32 = arith.constant 0 : i32
    %c0_i32_0 = arith.constant 0 : i32
    %c0_i32_1 = arith.constant 0 : i32
    return %c0_i32, %c0_i32_0 : i32, i32
  }
  func.func @transform_7(%arg0: i32) -> (i32, i32) {
    %c0_i32 = arith.constant 0 : i32
    %c0_i32_0 = arith.constant 0 : i32
    %c0_i32_1 = arith.constant 0 : i32
    return %c0_i32, %c0_i32_0 : i32, i32
  }
}

</mosaic_0001>

<bundles_post_ra>
// kernel: tpu_custom_call.1
= control target key start
LH: loop header
LB: loop body
LE: loop exit
PB: predicated region body
PF: predicated region fallthrough
CT: control target
= control target key end

     0   :  { %s1525_s0 = inlined_call_operand.hbm [shape: f32[16,32], index: 0, kind: input, shape index: {}]   ;;  %s1526_s1 = inlined_call_operand.hbm [shape: f32[16,8,32], index: 1, kind: input, shape index: {}]   ;;  %s1527_s2 = inlined_call_operand.hbm [shape: f32[32,64], index: 2, kind: input, shape index: {}]   ;;  %s1528_s3 = inlined_call_operand.hbm [shape: f32[32,64], index: 3, kind: input, shape index: {}]   ;;  %s1529_s4 = inlined_call_operand.hbm [shape: f32[32,64], index: 4, kind: input, shape index: {}]   ;;  %s1530_s5 = inlined_call_operand.vmem [shape: f32[1,64], index: 5, kind: input, shape index: {}]   ;;  %s1531_s6 = inlined_call_operand.hbm [shape: f32[1,64], index: 6, kind: output, shape index: {0}]   ;;  %s1532_s7 = inlined_call_operand.hbm [shape: f32[1,64], index: 7, kind: output, shape index: {1}]  }
   0x1   :  { %1535 = sst [smem:[#allocation20_spill]] %s1527_s2 }
   0x2   :  { %1536 = sst [smem:[#allocation21_spill]] %s1528_s3 }
   0x3   :  { %1537 = sst [smem:[#allocation22_spill]] %s1529_s4 }
   0x4   :  { %13 = vsyncpa [#allocation3], 0 }
   0x5   :  { %15 = vsyncpa [#allocation3 + $0x1], 0 }
   0x6   :  { %16 = vsyncpa [#allocation6], 0 }
   0x7   :  { %18 = vsyncpa [#allocation6 + $0x1], 0 }
   0x8   :  { %19 = vsyncpa [#allocation9], 0 }
   0x9   :  { %20 = vsyncpa [#allocation4], 0 }
   0xa   :  { %21 = vsyncpa [#allocation13], 0  ;;  %s1277_s24 = smov 0   ;;  %s1279_s25 = smov 0  }
   0xb   :  { %s1281_s26 = smov 0   ;;  %s1283_s27 = smov 0  }
   0xc LB: > { %s1538_s2 = sld [smem:[#allocation20_spill]]  ;;  %s1301_s8 = sadd.s32 4294967295, %s1227_s27   ;;  %s1227_s27 = sphi %s1283_s27, %s1550_s27   ;;  %s1223_s26 = sphi %s1281_s26, %s1549_s26   ;;  %s1219_s25 = sphi %s1279_s25, %s1548_s25   ;;  %s1215_s24 = sphi %s1277_s24, %s1547_s24  }
   0xd   : > { %p825_p0 = scmp.ge.s32.totalorder %s1227_s27, 1  ;;  %p48_p1 = scmp.eq.s32.totalorder %s1301_s8, 0 }
   0xe   : > { %p210_p2 = scmp.lt.s32.totalorder %s1227_s27, 3  ;;  %p826_p3 = scmp.ne.s32.totalorder %s1301_s8, 0 }
   0xf   : > { %s1229_s10 = smov [#allocation7]   ;;  %s1540_s3 = sld [smem:[#allocation21_spill]] }
  0x10   : > { %p1307_p4 = pnand %p825_p0, %p210_p2  ;;  %s223_s11 = sshll.u32 %s1229_s10, 4  ;;  %s224_s11 = int_to_ptr.vmem [resolvable:$true] %s223_s11 }
  0x11   : > { %s1542_s4 = sld [smem:[#allocation22_spill]]  ;;  %s1230_s19 = smov [#allocation8]  }
  0x12   : > { %s221_s30 = sshll.u32 %s1538_s2, 4  ;;  %p898_p5 = pneg %p1307_p4  ;;  %s222_s30 = int_to_ptr.hbm [resolvable:$true] %s221_s30 }
  0x13   : > { %s237_s20 = sshll.u32 %s1230_s19, 4  ;;  %s1533_s21 = smov 128   ;;  %s238_s20 = int_to_ptr.vmem [resolvable:$true] %s237_s20 }
  0x14   : > { %p1318_p6 = pnand %p898_p5, %p48_p1  ;;  %s1534_s22 = smov 8  }
  0x15   : > { %s235_s14 = sshll.u32 %s1540_s3, 4  ;;  %s1233_s23 = smov [#allocation10]   ;;  %s236_s14 = int_to_ptr.hbm [resolvable:$true] %s235_s14 }
  0x16   : > { %901 = dma.hbm_to_vmem [thread:$0]  (!%p1318_p6), %s222_s30, 512, %s224_s11, [#allocation6], %s1533_s21, %s1533_s21, %s1534_s22  }
  0x17   : > { %s249_s18 = sshll.u32 %s1542_s4, 4  ;;  %s251_s28 = sshll.u32 %s1233_s23, 4  ;;  %s250_s18 = int_to_ptr.hbm [resolvable:$true] %s249_s18  ;;  %s252_s28 = int_to_ptr.vmem [resolvable:$true] %s251_s28 }
  0x18   : > { %904 = dma.hbm_to_vmem [thread:$0]  (!%p1318_p6), %s236_s14, 512, %s238_s20, [#allocation9], %s1533_s21, %s1533_s21, %s1534_s22  }
  0x19   : > { %907 = dma.hbm_to_vmem [thread:$0]  (!%p1318_p6), %s250_s18, 512, %s252_s28, [#allocation9], %s1533_s21, %s1533_s21, %s1534_s22  }
  0x1a   : > { %s1341_s29 = sadd.s32 1, %s1227_s27   ;;  %s34_s10 = sadd.s32 1, %s1223_s26 }
  0x1b   : > { %s31_s30 = ssub.s32 %s1227_s27, %s1341_s29  ;;  %p41_p8 = scmp.ne.s32.totalorder %s1223_s26, %s1219_s25 }
  0x1c   : > { %p32_p7 = scmp.eq.s32.totalorder %s31_s30, 0  ;;  %p42_p9 = scmp.eq.s32.totalorder %s1227_s27, 0 }
  0x1d   : > { %p47_p10 = scmp.ne.s32.totalorder %s1219_s25, %s1215_s24  ;;  %p918_p13 = scmp.lt.s32.totalorder %s1227_s27, 2 }
  0x1e   : > { %s1352_s11 = scalar_select %p32_p7, %s1223_s26, %s34_s10  }
  0x1f   : > { %p43_p11 = por %p42_p9, %p41_p8  ;;  %p1356_p12 = por %p48_p1, %p47_p10 }
  0x20   : > { %s268_s13 = sand.u32 1, %s1223_s26   ;;  %s831_s15 = sshll.u32 %s1227_s27, 3 }
  0x21   : > { %s830_s14 = sshll.u32 %s268_s13, 3  ;;  %s276_s18 = scalar_lea.hbm %s1525_s0, %s831_s15 }
  0x22   : > { %s272_s19 = scalar_lea.vmem [#allocation2], %s830_s14  ;;  %s278_s24 = sshll.u32 %s276_s18, 4  ;;  %s279_s24 = int_to_ptr.hbm [resolvable:$true] %s278_s24 }
  0x23   : > { %s280_s20 = sshll.u32 %s272_s19, 4  ;;  %p1366_p0 = pnand %p918_p13, %p43_p11  ;;  %s281_s20 = int_to_ptr.vmem [resolvable:$true] %s280_s20 }
  0x24   : > { %s832_s28 = sshll.u32 %s268_s13, 6  ;;  %s287_s30 = sand.u32 1, %s1227_s27  }
  0x25   : > { %s269_s10 = scalar_lea.sflag [#allocation3], %s268_s13  ;;  %s1057_s21 = sshra.s32 %s279_s24, 4  ;;  %s1058_s21 = int_to_ptr.hbm [resolvable:$true] %s1057_s21 }
  0x26   : > { %s1059_s22 = scalar_lea.hbm %s1058_s21, 8  ;;  %p1061_p5 = pneg %p1366_p0 }
  0x27   : > { %p1060_p2 = scmp.ne.s32.totalorder %s1058_s21, %s1059_s22  ;;  %s1064_s16 = scalar_lea.hbm %s1525_s0, 16 }
  0x28   : > { %p1065_p8 = scmp.lt.s32.totalorder %s1058_s21, %s1525_s0  ;;  %p1066_p9 = scmp.lt.s32.totalorder %s1064_s16, %s1059_s22 }
  0x29   : > { %p1062_p6 = pnand %p1061_p5, %p1060_p2 }
  0x2a   : > { %p1067_p10 = por %p1066_p9, %p1065_p8 }
  0x2b   : > { %p1063_p7 = pneg %p1062_p6 }
  0x2d   : > { %p1068_p11 = pnand %p1067_p10, %p1063_p7 }
  0x2f   : > { %1071 = shalt.err (!%p1068_p11)
}
  0x30   : > { %911 = dma.hbm_to_vmem [thread:$0]  (!%p1366_p0), %s279_s24, 128, %s281_s20, %s269_s10  }
  0x31   : > { %s291_s13 = scalar_lea.vmem [#allocation5], %s832_s28  ;;  %s865_s2 = sshll.u32 %s1227_s27, 6 }
  0x32   : > { %s299_s19 = sshll.u32 %s291_s13, 4  ;;  %s296_s15 = scalar_lea.hbm %s1526_s1, %s865_s2  ;;  %s300_s19 = int_to_ptr.vmem [resolvable:$true] %s299_s19 }
  0x33   : > { %s297_s4 = sshll.u32 %s296_s15, 4  ;;  %s288_s21 = scalar_lea.sflag [#allocation6], %s287_s30  ;;  %s298_s4 = int_to_ptr.hbm [resolvable:$true] %s297_s4 }
  0x34   : > { %s1087_s22 = sshra.s32 %s298_s4, 4  ;;  %s1094_s27 = scalar_lea.hbm %s1526_s1, 128  ;;  %s1088_s22 = int_to_ptr.hbm [resolvable:$true] %s1087_s22 }
  0x35   : > { %s1089_s16 = scalar_lea.hbm %s1088_s22, 64  ;;  %p1095_p7 = scmp.lt.s32.totalorder %s1088_s22, %s1526_s1 }
  0x36   : > { %p1090_p13 = scmp.ne.s32.totalorder %s1088_s22, %s1089_s16  ;;  %p1096_p8 = scmp.lt.s32.totalorder %s1094_s27, %s1089_s16 }
  0x38   : > { %p1092_p2 = pnand %p1090_p13, %p1061_p5  ;;  %p1097_p9 = por %p1096_p8, %p1095_p7 }
  0x3a   : > { %p1093_p6 = pneg %p1092_p2 }
  0x3c   : > { %p1098_p10 = pnand %p1097_p9, %p1093_p6 }
  0x3e   : > { %1101 = shalt.err (!%p1098_p10)
}
  0x3f   : > { %s1545_s2 = smov 8   ;;  %s1546_s3 = smov 128  }
  0x40   : > { %914 = dma.hbm_to_vmem [thread:$0]  (!%p1366_p0), %s298_s4, 1024, %s300_s19, %s288_s21, %s1546_s3, %s1546_s3, %s1545_s2  }
  0x41   : > { %311 = sbr.rel (%p1307_p4) target bundleno = 292 (0x124), region = 44  ;;  %s313_s30 = sand.u32 (!%p1307_p4), 1, %s1219_s25  }
  0x42   : > { %s836_s17 = sshll.u32 (!%p1307_p4), %s313_s30, 3  ;;  %s314_s18 = scalar_lea.sflag (!%p1307_p4), [#allocation3], %s313_s30 }
  0x43   : > { %s1405_s13 = scalar_lea.vmem (!%p1307_p4), [#allocation2], %s836_s17 }
  0x46   : > { %1190 = dma.done.wait (%p1356_p12), %s314_s18, 128  }
  0x47   : > { %1192 = vsyncadd (%p1356_p12), %s314_s18, 4294967168  ;;  %s323_s23 = sand.u32 1, %s1301_s8   ;;  %s837_s14 = sshll.u32 %s313_s30, 6 }
  0x48   : > { %s324_s4 = scalar_lea.sflag [#allocation6], %s323_s23  ;;  %s1412_s19 = scalar_lea.vmem [#allocation5], %s837_s14 }
  0x49   : > { %1194 = dma.done.wait (%p1356_p12), %s324_s4, 1024  }
  0x4a   : > { %1196 = vsyncadd (%p1356_p12), %s324_s4, 4294966272 }
  0x4b   : > { %1198 = dma.done.wait (%p48_p1), [#allocation6], 512  }
  0x4c   : > { %1200 = vsyncadd (%p48_p1), [#allocation6], 4294966784 }
  0x4d   : > { %1202 = dma.done.wait (%p48_p1), [#allocation9], 1024  }
  0x4e   : > { %1204 = vsyncadd (%p48_p1), [#allocation9], 4294966272  ;;  %v419_v0 = vld [vmem:[#allocation7 + $0x18] sm:$0xff]  ;;  %v418_v3 = vld [vmem:[#allocation7 + $0x10] sm:$0xff]  ;;  %vm420_vm0 = vcmask 261120   ;;  %vm625_vm1 = vcmask 523264  }
  0x4f   : > { %v450_v1 = vld [vmem:[#allocation10 + $0x18] sm:$0xff]  ;;  %435 = vmatpush.msra.mxu0 %v419_v0  ;;  %v449_v4 = vld [vmem:[#allocation10 + $0x10] sm:$0xff]  ;;  %v417_v6 = vld [vmem:[#allocation7 + $0x8] sm:$0xff] }
  0x50   : > { %v446_v2 = vld [vmem:[#allocation8 + $0x18] sm:$0xff]  ;;  %487 = vmatpush.msra.mxu1 %v450_v1  ;;  %v445_v5 = vld [vmem:[#allocation8 + $0x10] sm:$0xff]  ;;  %v448_v7 = vld [vmem:[#allocation10 + $0x8] sm:$0xff]  ;;  %866 = vmatpush.msra.mxu3 %v450_v1 }
  0x51   : > { %870 = vmatpush.msra.mxu2 %v446_v2  ;;  %436 = vmatpush.msra.mxu0 %v418_v3  ;;  %v444_v8 = vld [vmem:[#allocation8 + $0x8] sm:$0xff]  ;;  %v416_v9 = vld [vmem:[#allocation7] sm:$0xff]  ;;  %v375_v11 = vld [vmem:[%s1405_s13] sm:$0xff] }
  0x52   : > { %488 = vmatpush.msra.mxu1 %v449_v4  ;;  %v447_v10 = vld [vmem:[#allocation10] sm:$0xff]  ;;  %867 = vmatpush.msra.mxu3 %v449_v4  ;;  %v392_v14 = vperm.slane %v375_v11, 0  ;;  %v385_v15 = vrot.slane %v375_v11, 1  ;;  %v379_v16 = vld [vmem:[%s1412_s19 + $0x18] sm:$0xff]  ;;  %v389_v17 = vrot.slane %v375_v11, 5  ;;  %v381_v19 = vld [vmem:[%s1412_s19 + $0x28] sm:$0xff] }
  0x53   : > { %871 = vmatpush.msra.mxu2 %v445_v5  ;;  %v376_v12 = vld [vmem:[%s1412_s19] sm:$0xff]  ;;  %437 = vmatpush.msra.mxu0 %v417_v6  ;;  %v390_v21 = vrot.slane %v375_v11, 6  ;;  %v377_v23 = vld [vmem:[%s1412_s19 + $0x8] sm:$0xff]  ;;  %v386_v27 = vrot.slane %v375_v11, 2  ;;  %v382_v28 = vld [vmem:[%s1412_s19 + $0x30] sm:$0xff]  ;;  %v391_v31 = vrot.slane %v375_v11, 7 }
  0x54   : > { %489 = vmatpush.msra.mxu1 %v448_v7  ;;  %v443_v13 = vld [vmem:[#allocation8] sm:$0xff]  ;;  %868 = vmatpush.msra.mxu3 %v448_v7  ;;  %v408_v18 = vmul.f32 %v392_v14, %v376_v12  ;;  %v397_v20 = vperm.slane %v389_v17, 0  ;;  %v393_v22 = vperm.slane %v385_v15, 0  ;;  %v378_v33 = vld [vmem:[%s1412_s19 + $0x10] sm:$0xff]  ;;  %v387_v35 = vrot.slane %v375_v11, 3  ;;  %v383_v37 = vld [vmem:[%s1412_s19 + $0x38] sm:$0xff] }
  0x55   : > { %872 = vmatpush.msra.mxu2 %v444_v8  ;;  %438 = vmatpush.msra.mxu0 %v416_v9  ;;  %v398_v25 = vperm.slane %v390_v21, 0  ;;  %v380_v29 = vld [vmem:[%s1412_s19 + $0x20] sm:$0xff]  ;;  %v394_v32 = vperm.slane %v386_v27, 0  ;;  %v399_v34 = vperm.slane %v391_v31, 0  ;;  %v388_v41 = vrot.slane %v375_v11, 4 }
  0x56   : > { %490 = vmatpush.msra.mxu1 %v447_v10  ;;  %841 = vmatmul.msk.f32.vlgmr.msra.gmra.mxu0 %vm420_vm0, %v375_v11  ;;  %v413_v24 = vmul.f32 %v397_v20, %v381_v19  ;;  %v409_v26 = vmul.f32 %v393_v22, %v377_v23  ;;  %v395_v39 = vperm.slane %v387_v35, 0  ;;  %v1459_v59 = vld [vmem:[%s1530_s5] ss:$0 sm:$0xff] }
  0x57   : > { %873 = vmatpush.msra.mxu2 %v443_v13  ;;  %842 = vmatmul.msk.f32.vlgmr.msra.gmra.mxu1 %vm420_vm0, %v408_v18  ;;  %v414_v30 = vmul.f32 %v398_v25, %v382_v28  ;;  %v410_v36 = vmul.f32 %v394_v32, %v378_v33  ;;  %v415_v38 = vmul.f32 %v399_v34, %v383_v37  ;;  %v396_v42 = vperm.slane %v388_v41, 0 }
  0x58   : > { %853 = vmatmul.msk.f32.vlgmr.msra.gmra.mxu2 %vm420_vm0, %v379_v16  ;;  %552 = vmatpush.msrb.mxu0 %v446_v2  ;;  %v411_v40 = vmul.f32 %v395_v39, %v379_v16 }
  0x59   : > { %869 = vmatpush.msra.mxu3 %v447_v10  ;;  %v412_v43 = vmul.f32 %v396_v42, %v380_v29 }
  0x5a   : > { %553 = vmatpush.msrb.mxu0 %v445_v5  ;;  %847 = vmatmul.msk.f32.vlgmr.msra.gmra.mxu3 %vm420_vm0, %v413_v24 }
  0x5c   : > { %554 = vmatpush.msrb.mxu0 %v444_v8 }
  0x5e   : > { %555 = vmatpush.msrb.mxu0 %v443_v13 }
  0x5f   : > { %843 = vmatmul.msk.f32.gmra.mxu1 %vm420_vm0, %v409_v26  ;;  %850 = vmatmul.msk.f32.vlgmr.msrb.gmra.mxu0 %vm420_vm0, %v376_v12 }
  0x60   : > { %854 = vmatmul.msk.f32.gmra.mxu2 %vm420_vm0, %v380_v29 }
  0x62   : > { %848 = vmatmul.msk.f32.gmra.mxu3 %vm420_vm0, %v414_v30 }
  0x67   : > { %844 = vmatmul.msk.f32.gmra.mxu1 %vm420_vm0, %v410_v36  ;;  %851 = vmatmul.msk.f32.gmra.mxu0 %vm420_vm0, %v377_v23 }
  0x68   : > { %855 = vmatmul.msk.f32.gmra.mxu2 %vm420_vm0, %v381_v19 }
  0x6a   : > { %849 = vmatmul.msk.f32.gmra.mxu3 %vm420_vm0, %v415_v38 }
  0x6f   : > { %845 = vmatmul.msk.f32.gmra.mxu1 %vm420_vm0, %v411_v40  ;;  %852 = vmatmul.msk.f32.gmra.mxu0 %vm420_vm0, %v378_v33 }
  0x70   : > { %856 = vmatmul.msk.f32.gmra.mxu2 %vm420_vm0, %v382_v28 }
  0x77   : > { %846 = vmatmul.msk.f32.gmra.mxu1 %vm420_vm0, %v412_v43 }
  0x78   : > { %857 = vmatmul.msk.f32.gmra.mxu2 %vm420_vm0, %v383_v37 }
  0xd3   : > { %v1452_v44 = vpop.f32.mrf.mxu0 }
  0xd4   : > { %v492_v45 = vpop.f32.mrf.mxu1  ;;  %v582_v49 = vrot.slane %v1452_v44, 1  ;;  %v589_v57 = vperm.slane %v1452_v44, 0  ;;  %v584_v60 = vrot.slane %v1452_v44, 3  ;;  %v583_v62 = vrot.slane %v1452_v44, 2 }
  0xd5   : > { %v586_v1 = vrot.slane %v1452_v44, 5  ;;  %v587_v14 = vrot.slane %v1452_v44, 6  ;;  %v585_v15 = vrot.slane %v1452_v44, 4  ;;  %v588_v42 = vrot.slane %v1452_v44, 7 }
  0xd6   : > { %v590_v55 = vperm.slane %v582_v49, 0  ;;  %v592_v3 = vperm.slane %v584_v60, 0  ;;  %v591_v8 = vperm.slane %v583_v62, 0 }
  0xd7   : > { %v594_v18 = vperm.slane %v586_v1, 0  ;;  %v595_v29 = vperm.slane %v587_v14, 0  ;;  %v593_v34 = vperm.slane %v585_v15, 0 }
  0xdb   : > { %v566_v46 = vpop.f32.mrf.mxu2 }
  0xdc   : > { %v495_v47 = vpop.f32.mrf.mxu1  ;;  %v557_v48 = vpop.f32.mrf.mxu0 }
  0xdd   : > { %v558_v53 = vadd.f32 %v557_v48, %v492_v45  ;;  %v507_v56 = vpop.f32.mrf.mxu3 }
  0xdf   : > { %v605_v61 = vadd.f32 %v589_v57, %v558_v53  ;;  %v596_v57 = vperm.slane %v588_v42, 0 }
  0xe1   : > { %v617_v5 = vadd.f32 %v1459_v59, %v605_v61 }
  0xe3   : > { %v569_v50 = vpop.f32.mrf.mxu2  ;;  %v647_v16 = vmul.f32 %v617_v5, %v617_v5  ;;  %v626_v20 = vsel %vm625_vm1, %v617_v5, 0.0 }
  0xe4   : > { %v498_v51 = vpop.f32.mrf.mxu1  ;;  %v560_v52 = vpop.f32.mrf.mxu0 }
  0xe5   : > { %v561_v54 = vadd.f32 %v560_v52, %v495_v47  ;;  %v510_v13 = vpop.f32.mrf.mxu3  ;;  %v655_v31 = vsel %vm625_vm1, %v647_v16, 0.0 }
  0xe7   : > { %v606_v58 = vadd.f32 %v590_v55, %v561_v54 }
  0xe9   : > { %v618_v63 = vadd.f32 %v1459_v59, %v606_v58 }
  0xeb   : > { %v572_v0 = vpop.f32.mrf.mxu2  ;;  %v648_v9 = vmul.f32 %v618_v63, %v618_v63  ;;  %v627_v17 = vsel %vm625_vm1, %v618_v63, 0.0 }
  0xec   : > { %v501_v2 = vpop.f32.mrf.mxu1  ;;  %v563_v4 = vpop.f32.mrf.mxu0  ;;  %v573_v10 = vadd.f32 %v572_v0, %v507_v56  ;;  %v628_v27 = vadd.f32 %v627_v17, %v626_v20 }
  0xed   : > { %v567_v6 = vadd.f32 %v566_v46, %v501_v2  ;;  %v564_v7 = vadd.f32 %v563_v4, %v498_v51  ;;  %v656_v21 = vsel %vm625_vm1, %v648_v9, 0.0  ;;  %v513_v47 = vpop.f32.mrf.mxu3 }
  0xee   : > { %v610_v22 = vadd.f32 %v594_v18, %v573_v10  ;;  %v657_v35 = vadd.f32 %v656_v21, %v655_v31 }
  0xef   : > { %v608_v11 = vadd.f32 %v592_v3, %v567_v6  ;;  %v607_v12 = vadd.f32 %v591_v8, %v564_v7 }
  0xf0   : > { %v622_v38 = vadd.f32 %v1459_v59, %v610_v22 }
  0xf1   : > { %v619_v19 = vadd.f32 %v1459_v59, %v607_v12  ;;  %v620_v23 = vadd.f32 %v1459_v59, %v608_v11 }
  0xf2   : > { %v652_v49 = vmul.f32 %v622_v38, %v622_v38  ;;  %v635_v44 = vsel %vm625_vm1, %v622_v38, 0.0 }
  0xf3   : > { %v629_v24 = vsel %vm625_vm1, %v619_v19, 0.0  ;;  %v649_v25 = vmul.f32 %v619_v19, %v619_v19  ;;  %v575_v26 = vpop.f32.mrf.mxu2  ;;  %v650_v39 = vmul.f32 %v620_v23, %v620_v23  ;;  %v631_v43 = vsel %vm625_vm1, %v620_v23, 0.0 }
  0xf4   : > { %v576_v28 = vadd.f32 %v575_v26, %v510_v13  ;;  %v504_v30 = vpop.f32.mrf.mxu1  ;;  %v630_v36 = vadd.f32 %v629_v24, %v628_v27  ;;  %v664_v0 = vsel %vm625_vm1, %v652_v49, 0.0 }
  0xf5   : > { %v658_v32 = vsel %vm625_vm1, %v649_v25, 0.0  ;;  %v570_v33 = vadd.f32 %v569_v50, %v504_v30  ;;  %v660_v50 = vsel %vm625_vm1, %v650_v39, 0.0 }
  0xf6   : > { %v611_v37 = vadd.f32 %v595_v29, %v576_v28  ;;  %v659_v41 = vadd.f32 %v658_v32, %v657_v35  ;;  %v632_v48 = vadd.f32 %v631_v43, %v630_v36 }
  0xf7   : > { %v609_v40 = vadd.f32 %v593_v34, %v570_v33 }
  0xf8   : > { %v623_v45 = vadd.f32 %v1459_v59, %v611_v37  ;;  %v661_v55 = vadd.f32 %v660_v50, %v659_v41 }
  0xf9   : > { %v621_v46 = vadd.f32 %v1459_v59, %v609_v40 }
  0xfa   : > { %v653_v58 = vmul.f32 %v623_v45, %v623_v45  ;;  %v637_v1 = vsel %vm625_vm1, %v623_v45, 0.0 }
  0xfb   : > { %v633_v51 = vsel %vm625_vm1, %v621_v46, 0.0  ;;  %v651_v52 = vmul.f32 %v621_v46, %v621_v46  ;;  %v578_v53 = vpop.f32.mrf.mxu2 }
  0xfc   : > { %v634_v54 = vadd.f32 %v633_v51, %v632_v48  ;;  %v579_v56 = vadd.f32 %v578_v53, %v513_v47  ;;  %v666_v5 = vsel %vm625_vm1, %v653_v58, 0.0 }
  0xfd   : > { %v662_v60 = vsel %vm625_vm1, %v651_v52, 0.0 }
  0xfe   : > { %v636_v61 = vadd.f32 %v635_v44, %v634_v54  ;;  %v663_v62 = vadd.f32 %v662_v60, %v661_v55  ;;  %v612_v63 = vadd.f32 %v596_v57, %v579_v56 }
 0x100   : > { %v665_v2 = vadd.f32 %v664_v0, %v663_v62  ;;  %v624_v3 = vadd.f32 %v1459_v59, %v612_v63  ;;  %v638_v4 = vadd.f32 %v637_v1, %v636_v61 }
 0x102   : > { %v639_v6 = vsel %vm625_vm1, %v624_v3, 0.0  ;;  %v654_v7 = vmul.f32 %v624_v3, %v624_v3  ;;  %v667_v8 = vadd.f32 %v666_v5, %v665_v2 }
 0x103   : > { %v640_v9 = vadd.f32 %v639_v6, %v638_v4 }
 0x104   : > { %v668_v10 = vsel %vm625_vm1, %v654_v7, 0.0 }
 0x105   : > { %v641_v11 = vrot.slane %v640_v9, 4  ;;  %v669_v12 = vadd.f32 %v668_v10, %v667_v8 }
 0x107   : > { %v642_v13 = vadd.f32 %v641_v11, %v640_v9  ;;  %v670_v14 = vrot.slane %v669_v12, 4 }
 0x109   : > { %v643_v15 = vrot.slane %v642_v13, 2  ;;  %v671_v16 = vadd.f32 %v670_v14, %v669_v12 }
 0x10b   : > { %v644_v17 = vadd.f32 %v643_v15, %v642_v13  ;;  %v672_v18 = vrot.slane %v671_v16, 2 }
 0x10d   : > { %v645_v19 = vrot.slane %v644_v17, 1  ;;  %v673_v59 = vadd.f32 %v672_v18, %v671_v16  ;;  %679 = sbr.rel (%p826_p3) target bundleno = 277 (0x115), region = 68 }
 0x10f   : > { %v646_v20 = vadd.f32 %v645_v19, %v644_v17  ;;  %v674_v21 = vrot.slane %v673_v59, 1 }
 0x111   : > { %v675_v22 = vadd.f32 %v674_v21, %v673_v59 }
 0x112   : > { %vm680_vm2 = vcmask 516096   ;;  %v1234_v23 = vmov 0.0  }
 0x113   : > { %681 = vst.msk [vmem:[#allocation11] sm:$0x1] %vm680_vm2, %v1234_v23 }
 0x114   : > { %682 = vst.msk [vmem:[#allocation12] sm:$0x1] %vm680_vm2, %v1234_v23 }
 0x115 PF: > { %vm685_vm3 = vcmask 516096   ;;  %p922_p1 = scmp.eq.s32.totalorder %s1301_s8, 1  ;;  %s1235_s15 = smov [#allocation11]  }
 0x116   : > { %s696_s21 = sshll.u32 %s1235_s15, 4  ;;  %s698_s20 = sshll.u32 %s1531_s6, 4  ;;  %s697_s21 = int_to_ptr.vmem [resolvable:$true] %s696_s21  ;;  %s699_s20 = int_to_ptr.hbm [resolvable:$true] %s698_s20 }
 0x117   : > { %s710_s28 = sshll.u32 %s1532_s7, 4  ;;  %s1236_s10 = smov [#allocation12]   ;;  %s711_s28 = int_to_ptr.hbm [resolvable:$true] %s710_s28 }
 0x118   : > { %s708_s2 = sshll.u32 %s1236_s10, 4  ;;  %s709_s2 = int_to_ptr.vmem [resolvable:$true] %s708_s2 }
 0x11a   : > { %v683_v24 = vld [vmem:[#allocation11] sm:$0x1] }
 0x11b   : > { %v687_v25 = vld [vmem:[#allocation12] sm:$0x1]  ;;  %v684_v26 = vadd.f32 %v683_v24, %v646_v20 }
 0x11c   : > { %v688_v27 = vadd.f32 %v687_v25, %v675_v22 }
 0x11d   : > { %686 = vst.msk [vmem:[#allocation11] sm:$0x1] %vm685_vm3, %v684_v26 }
 0x11e   : > { %689 = vst.msk [vmem:[#allocation12] sm:$0x1] %vm685_vm3, %v688_v27  ;;  %891 = dma.vmem_to_hbm [thread:$0]  (%p922_p1), %s697_s21, 16, %s699_s20, [#allocation4]  }
 0x11f   : > { %893 = dma.vmem_to_hbm [thread:$0]  (%p922_p1), %s709_s2, 16, %s711_s28, [#allocation13]  }
 0x120   : > { %1206 = dma.done.wait (%p922_p1), [#allocation4], 16  }
 0x121   : > { %1208 = vsyncadd (%p922_p1), [#allocation4], 4294967280 }
 0x122   : > { %1210 = dma.done.wait (%p922_p1), [#allocation13], 16  }
 0x123   : > { %1212 = vsyncadd (%p922_p1), [#allocation13], 4294967280 }
 0x124 PF: > { %p24_p3 = scmp.ge.s32.totalorder %s1341_s29, 4   ;;  %s1547_s24 = smov %s1219_s25 }
 0x125   : > { %s1548_s25 = smov %s1223_s26  ;;  %s1549_s26 = smov %s1352_s11 }
 0x126   : > { %s1550_s27 = smov %s1341_s29  ;;  %26 = sbr.rel (!%p24_p3) target bundleno = 12 (0xc), region = 118 }
 0x12b   :  { %729 = vsyncpa [#allocation3], 1 }
 0x12c   :  { %731 = vsyncpa [#allocation3 + $0x1], 1 }
 0x12d   :  { %732 = vsyncpa [#allocation6], 1 }
 0x12e   :  { %734 = vsyncpa [#allocation6 + $0x1], 1 }
 0x12f   :  { %735 = vsyncpa [#allocation9], 1 }
 0x130   :  { %736 = vsyncpa [#allocation4], 1 }
 0x131   :  { %738 = vsyncpa [#allocation4 + $0x1], 1 }
 0x132   :  { %739 = vsyncpa [#allocation13], 1 }

</bundles_post_ra>
